<compile_context>
chip_gen: v7x
topology: tpu7x:2x2x1
jax: 0.10.0
libtpu: 0.0.40
codegen_flags: <defaults>
</compile_context>

<pallas_src>
import jax
import jax.numpy as jnp
from jax.experimental import pallas as pl
from jax.experimental.pallas import tpu as pltpu


def policy_kernel(dwdb_ref, x_ref, p1_ref):
    # dwdb_ref: SMEM (2,) = [w1 - w0, b1 - b0]
    # x_ref:    VMEM (tb, lanes) lane-dense slab of batch elements
    dw = dwdb_ref[0]
    db = dwdb_ref[1]
    # 2-class softmax == sigmoid of the logit difference (VPU mul-add + EUP sigmoid).
    p1_ref[...] = jax.nn.sigmoid(x_ref[...] * dw + db)


def simple_policy_forward(state, weight, bias, *, lanes=512, tile_rows=512):
    """state: (B, 1) f32; weight: (2, 1) f32 (PyTorch layout); bias: (2,) f32 -> (B, 2)."""
    B = state.shape[0]

    # Normalize tiling args so the (8, 128) BlockSpec constraint always holds.
    lanes = max(128, ((int(lanes) + 127) // 128) * 128)      # multiple of 128 lanes
    tile_rows = max(8, ((int(tile_rows) + 7) // 8) * 8)      # multiple of 8 sublanes

    x_flat = state.reshape(-1).astype(jnp.float32)           # (B,)

    # Fold the 4 Linear params into the 2 scalars actually needed (SMEM).
    dwdb = jnp.stack([weight[1, 0] - weight[0, 0],
                      bias[1] - bias[0]]).astype(jnp.float32)  # (2,)

    # Lane-dense layout: rows of `lanes` elements, 8-sublane aligned.
    rows = pl.cdiv(B, lanes)
    rows8 = max(8, ((rows + 7) // 8) * 8)

    # Cap block height so big batches yield >= 4 grid steps (keeps both v7x TCs busy
    # via the "parallel" dimension semantic); 8-multiple floor keeps blocks legal.
    tb_cap = max(8, (rows8 // 4) // 8 * 8)
    tb = min(tile_rows, rows8, tb_cap)
    rows_padded = pl.cdiv(rows8, tb) * tb

    # Single cheap pad of the flat input (no full-slab zero+scatter pass).
    pad_total = rows_padded * lanes - B
    x2d = jnp.pad(x_flat, (0, pad_total)).reshape(rows_padded, lanes)

    grid = (rows_padded // tb,)
    p1 = pl.pallas_call(
        policy_kernel,
        grid=grid,
        out_shape=jax.ShapeDtypeStruct((rows_padded, lanes), jnp.float32),
        in_specs=[
            pl.BlockSpec(memory_space=pltpu.MemorySpace.SMEM),   # [dw, db] scalars
            pl.BlockSpec((tb, lanes), lambda i: (i, 0)),         # lane-dense state
        ],
        out_specs=pl.BlockSpec((tb, lanes), lambda i: (i, 0)),   # lane-dense p1 plane
        compiler_params=pltpu.CompilerParams(
            dimension_semantics=("parallel",),   # batch tiles shard across TCs (v7x)
            vmem_limit_bytes=32 * 1024 * 1024,   # safe for v7x's 64 MiB VMEM
        ),
    )(dwdb, x2d)

    # Drop padding and build the PyTorch (B, 2) class layout; (1 - p1) fuses into the
    # interleave so this is the only post-kernel pass over the output.
    p1f = p1.reshape(-1)[:B]
    return jnp.stack([1.0 - p1f, p1f], axis=1)


if __name__ == "__main__":
    key = jax.random.PRNGKey(0)
    k_state, k_w, k_b, k_big = jax.random.split(key, 4)

    # nn.Linear(1, 2) params: weight (2, 1), bias (2,), U(-1/sqrt(1), +1/sqrt(1)).
    bound = 1.0
    weight = jax.random.uniform(k_w, (2, 1), jnp.float32, -bound, bound)
    bias = jax.random.uniform(k_b, (2,), jnp.float32, -bound, bound)

    def ref_forward(s):
        return jax.nn.softmax(s @ weight.T + bias, axis=1)

    # Small batch (matches the PyTorch usage pattern of one state per step).
    B = 8
    state = jax.random.normal(k_state, (B, 1), dtype=jnp.float32)
    out = jax.block_until_ready(simple_policy_forward(state, weight, bias))
    assert out.shape == (B, 2)
    assert jnp.allclose(out, ref_forward(state), atol=1e-6, rtol=1e-5)
    assert jnp.allclose(jnp.sum(out, axis=1), 1.0, atol=1e-6)

    # Ragged, multi-tile batch exercising the padding + multi-step grid path
    # (default production-size blocks; tb auto-capped to give >= 2 grid steps).
    B2 = 10000
    state2 = jax.random.normal(k_big, (B2, 1), dtype=jnp.float32)
    out2 = jax.block_until_ready(simple_policy_forward(state2, weight, bias))
    assert out2.shape == (B2, 2)
    assert jnp.allclose(out2, ref_forward(state2), atol=1e-6, rtol=1e-5)
    assert jnp.allclose(jnp.sum(out2, axis=1), 1.0, atol=1e-6)

    print("KERNEL_OK")
</pallas_src>

<mosaic_0001>
module attributes {stable_mosaic.version = 11 : i64} {
  func.func @policy_kernel(%arg0: i32, %arg1: memref<2xf32, #tpu.memory_space<smem>>, %arg2: memref<8x512xf32, #tpu.memory_space<vmem>>, %arg3: memref<8x512xf32, #tpu.memory_space<vmem>>) attributes {dimension_semantics = [#tpu.dimension_semantics<parallel>], iteration_bounds = array<i64: 1>, scalar_prefetch = 0 : i64, scratch_operands = 0 : i64, tpu.core_type = #tpu.core_type<tc>, window_params = [{transform_indices = @transform_0, window_bounds = array<i64: 2>}, {transform_indices = @transform_1, window_bounds = array<i64: 8, 512>}, {transform_indices = @transform_2, window_bounds = array<i64: 8, 512>}]} {
    %c0 = arith.constant 0 : index
    %0 = memref.load %arg1[%c0] : memref<2xf32, #tpu.memory_space<smem>>
    %c1 = arith.constant 1 : index
    %1 = memref.load %arg1[%c1] : memref<2xf32, #tpu.memory_space<smem>>
    %c0_0 = arith.constant 0 : index
    %c0_1 = arith.constant 0 : index
    %2 = vector.load %arg2[%c0_0, %c0_1] : memref<8x512xf32, #tpu.memory_space<vmem>>, vector<8x512xf32>
    %3 = vector.broadcast %0 : f32 to vector<8x512xf32>
    %4 = arith.mulf %2, %3 : vector<8x512xf32>
    %5 = vector.broadcast %1 : f32 to vector<8x512xf32>
    %6 = arith.addf %4, %5 : vector<8x512xf32>
    %7 = arith.negf %6 : vector<8x512xf32>
    %8 = math.exp %7 : vector<8x512xf32>
    %cst = arith.constant 1.000000e+00 : f32
    %9 = vector.broadcast %cst : f32 to vector<8x512xf32>
    %10 = arith.addf %9, %8 : vector<8x512xf32>
    %11 = arith.divf %9, %10 : vector<8x512xf32>
    %c0_2 = arith.constant 0 : index
    %c0_3 = arith.constant 0 : index
    %12 = vector.load %arg3[%c0_2, %c0_3] : memref<8x512xf32, #tpu.memory_space<vmem>>, vector<8x512xf32>
    tpu.vector_store %arg3[%c0_2, %c0_3], %11 {strides = array<i32>} : memref<8x512xf32, #tpu.memory_space<vmem>>, vector<8x512xf32>,
    return
  }
  func.func @transform_0(%arg0: i32) -> i32 {
    %c0_i32 = arith.constant 0 : i32
    %c0_i32_0 = arith.constant 0 : i32
    return %c0_i32 : i32
  }
  func.func @transform_1(%arg0: i32) -> (i32, i32) {
    %c0_i32 = arith.constant 0 : i32
    %c0_i32_0 = arith.constant 0 : i32
    return %arg0, %c0_i32 : i32, i32
  }
  func.func @transform_2(%arg0: i32) -> (i32, i32) {
    %c0_i32 = arith.constant 0 : i32
    %c0_i32_0 = arith.constant 0 : i32
    return %arg0, %c0_i32 : i32, i32
  }
}

</mosaic_0001>

<bundles_post_ra>
// kernel: tpu_custom_call.1
= control target key start
LH: loop header
LB: loop body
LE: loop exit
PB: predicated region body
PF: predicated region fallthrough
CT: control target
= control target key end

     0   :  { %7 = vsyncpa [#allocation5], 0  ;;  %s233_s0 = inlined_call_operand.hbm [shape: f32[2], index: 0, kind: input, shape index: {}]   ;;  %s234_s1 = inlined_call_operand.hbm [shape: f32[8,512], index: 1, kind: input, shape index: {}]   ;;  %s235_s2 = inlined_call_operand.hbm [shape: f32[8,512], index: 2, kind: output, shape index: {}]  }
   0x1   :  { %8 = vsyncpa [#allocation3], 0 }
   0x2   :  { %9 = vsyncpa [#allocation4], 0  ;;  %s119_s11 = scalar_lea.hbm %s233_s0, 16 }
   0x3   :  { %p120_p0 = scmp.ne.s32.totalorder %s233_s0, %s119_s11  ;;  %p123_p1 = scmp.lt.u32.totalorder %s119_s11, %s233_s0 }
   0x5   :  { %p125_p2 = pnand %p123_p1, %p120_p0 }
   0x7   :  { %128 = shalt.err (!%p125_p2)
}
   0x8   :  { %s179_s16 = smov [#allocation2]   ;;  %s180_s19 = smov [#allocation6]  }
   0x9   :  { %17 = dma.hbm_to_smem %s233_s0, 16, %s179_s16, [#allocation5]  }
   0xa   :  { %s24_s20 = sshll.u32 %s180_s19, 4  ;;  %s129_s23 = scalar_lea.hbm %s234_s1, 512  ;;  %s25_s20 = int_to_ptr.vmem [resolvable:$true] %s24_s20 }
   0xb   :  { %p130_p3 = scmp.ne.s32.totalorder %s234_s1, %s129_s23  ;;  %p133_p4 = scmp.lt.u32.totalorder %s129_s23, %s234_s1 }
   0xd   :  { %p135_p5 = pnand %p133_p4, %p130_p3 }
   0xf   :  { %138 = shalt.err (!%p135_p5)
}
  0x10   :  { %s139_s28 = scalar_lea.vmem %s25_s20, 512  ;;  %p144_p7 = scmp.lt.s32.totalorder %s25_s20, %s25_s20 }
  0x11   :  { %p140_p6 = scmp.ne.s32.totalorder %s25_s20, %s139_s28  ;;  %p145_p8 = scmp.lt.s32.totalorder %s139_s28, %s139_s28 }
  0x13   :  { %p146_p9 = por %p145_p8, %p144_p7 }
  0x15   :  { %p147_p10 = pnand %p146_p9, %p140_p6 }
  0x17   :  { %150 = shalt.err (!%p147_p10)
}
  0x18   :  { %27 = dma.hbm_to_vmem [thread:$0]  %s234_s1, 512, %s25_s20, [#allocation3]  }
  0x19   :  { %173 = dma.done.wait [#allocation5], 16  }
  0x1a   :  { %174 = vsyncadd [#allocation5], 4294967280 }
  0x1b   :  { %175 = dma.done.wait [#allocation3], 512  }
  0x1c   :  { %176 = vsyncadd [#allocation3], 4294966784 }
  0x1d   :  { %34 = sfence }
  0x1e   :  { %s35_s30 = sld [smem:[#allocation2]]  ;;  %s95_s3 = sld [smem:[#allocation2 + $0x1]]  ;;  %v37_v0 = vld [vmem:[#allocation6] sm:$0xff]  ;;  %v38_v1 = vld [vmem:[#allocation6 + $0x8] sm:$0xff]  ;;  %v39_v2 = vld [vmem:[#allocation6 + $0x10] sm:$0xff] }
  0x1f   :  { %v40_v3 = vld [vmem:[#allocation6 + $0x18] sm:$0xff]  ;;  %s181_s1 = smov [#allocation7]  }
  0x20   :  { %s85_s4 = sshll.u32 %s181_s1, 4  ;;  %s86_s4 = int_to_ptr.vmem [resolvable:$true] %s85_s4 }
  0x21   :  { %s151_s5 = scalar_lea.vmem %s86_s4, 512  ;;  %p156_p12 = scmp.lt.s32.totalorder %s86_s4, %s86_s4 }
  0x22   :  { %p152_p11 = scmp.ne.s32.totalorder %s86_s4, %s151_s5  ;;  %p157_p13 = scmp.lt.s32.totalorder %s151_s5, %s151_s5 }
  0x24   :  { %v41_v4 = vstv %s35_s30  ;;  %v46_v5 = vstv %s95_s3  ;;  %p158_p0 = por %p157_p13, %p156_p12 }
  0x25   :  { %v42_v6 = vmul.f32 %v41_v4, %v37_v0  ;;  %v43_v7 = vmul.f32 %v41_v4, %v38_v1  ;;  %v44_v8 = vmul.f32 %v41_v4, %v39_v2  ;;  %v45_v9 = vmul.f32 %v41_v4, %v40_v3 }
  0x26   :  { %p159_p1 = pnand %p158_p0, %p152_p11 }
  0x27   :  { %v47_v10 = vadd.f32 %v46_v5, %v42_v6  ;;  %v48_v11 = vadd.f32 %v46_v5, %v43_v7  ;;  %v49_v12 = vadd.f32 %v46_v5, %v44_v8  ;;  %v50_v13 = vadd.f32 %v46_v5, %v45_v9 }
  0x29   :  { %v96_v14 = vmul.f32 -1.442695, %v47_v10  ;;  %v97_v15 = vmul.f32 -1.442695, %v48_v11  ;;  %v98_v16 = vmul.f32 -1.442695, %v49_v12 }
  0x2a   :  { %v99_v17 = vmul.f32 -1.442695, %v50_v13 }
  0x2b   :  { %103 = vpow2.f32 %v96_v14 }
  0x2c   :  { %105 = vpow2.f32 %v97_v15 }
  0x2d   :  { %107 = vpow2.f32 %v98_v16 }
  0x2e   :  { %109 = vpow2.f32 %v99_v17 }
  0x35   :  { %v104_v18 = vpop.eup %103 }
  0x36   :  { %v106_v19 = vpop.eup %105  ;;  %v63_v20 = vadd.f32 1.0, %v104_v18 }
  0x37   :  { %v108_v21 = vpop.eup %107  ;;  %v64_v22 = vadd.f32 1.0, %v106_v19 }
  0x38   :  { %v110_v23 = vpop.eup %109  ;;  %111 = vrcp.f32 %v63_v20  ;;  %v65_v24 = vadd.f32 1.0, %v108_v21 }
  0x39   :  { %113 = vrcp.f32 %v64_v22  ;;  %v66_v25 = vadd.f32 1.0, %v110_v23 }
  0x3a   :  { %115 = vrcp.f32 %v65_v24 }
  0x3b   :  { %117 = vrcp.f32 %v66_v25 }
  0x42   :  { %v112_v26 = vpop.eup %111 }
  0x43   :  { %v114_v27 = vpop.eup %113  ;;  %75 = vst [vmem:[#allocation7] sm:$0xff] %v112_v26 }
  0x44   :  { %v116_v28 = vpop.eup %115  ;;  %76 = vst [vmem:[#allocation7 + $0x8] sm:$0xff] %v114_v27 }
  0x45   :  { %v118_v29 = vpop.eup %117  ;;  %77 = vst [vmem:[#allocation7 + $0x10] sm:$0xff] %v116_v28 }
  0x46   :  { %78 = vst [vmem:[#allocation7 + $0x18] sm:$0xff] %v118_v29 }
  0x47   :  { %162 = shalt.err (!%p159_p1)
}
  0x48   :  { %s163_s8 = scalar_lea.hbm %s235_s2, 512 }
  0x49   :  { %p164_p2 = scmp.ne.s32.totalorder %s235_s2, %s163_s8  ;;  %p167_p3 = scmp.lt.u32.totalorder %s163_s8, %s235_s2 }
  0x4b   :  { %p169_p4 = pnand %p167_p3, %p164_p2 }
  0x4d   :  { %172 = shalt.err (!%p169_p4)
}
  0x4e   :  { %88 = dma.vmem_to_hbm [thread:$0]  %s86_s4, 512, %s235_s2, [#allocation4]  }
  0x4f   :  { %177 = dma.done.wait [#allocation4], 512  }
  0x50   :  { %178 = vsyncadd [#allocation4], 4294966784 }
  0x51   :  { %92 = vsyncpa [#allocation3], 1 }
  0x52   :  { %93 = vsyncpa [#allocation4], 1 }
  0x53   :  { %94 = vsyncpa [#allocation5], 1 }

</bundles_post_ra>
